<compile_context>
chip_gen: v7x
topology: tpu7x:2x2x1
jax: 0.10.0
libtpu: 0.0.40
codegen_flags: <defaults>
</compile_context>

<pallas_src>
import jax
import jax.numpy as jnp
from jax.experimental import pallas as pl
from jax.experimental.pallas import tpu as pltpu

_BN_EPS = 1e-5
_LANE = 128
_MIB = 1 << 20


def mlp_pro_kernel(x_ref, w1_ref, bgb_ref, w2_ref, b2_ref, o_ref):
    ht = pl.program_id(0)

    # o_ref's block index is constant across the H (reduction) axis, so the
    # f32 output block stays resident in VMEM: use it as the accumulator.
    @pl.when(ht == 0)
    def _init():
        o_ref[...] = jnp.broadcast_to(b2_ref[...], o_ref.shape)

    # ---- fc1 tile + tanh: bf16 operands at rest, f32 accumulation on MXU ----
    bgb = bgb_ref[...]                                   # [8, TH] f32: b1/gamma/beta
    h = jnp.dot(x_ref[...], w1_ref[...],
                preferred_element_type=jnp.float32)      # [B, TH] f32
    h = jnp.tanh(h + bgb[0:1, :])

    # ---- BatchNorm1d (training forward) stats over the batch ----
    # Sublane (XLU) reductions in f32: keeps the MXU free for the two main
    # matmuls and avoids bf16-pass cancellation of an f32-operand MXU reduce.
    inv_b = 1.0 / h.shape[0]
    mean = jnp.sum(h, axis=0, keepdims=True) * inv_b          # [1, TH]
    m2 = jnp.sum(h * h, axis=0, keepdims=True) * inv_b        # [1, TH]
    var = jnp.maximum(m2 - mean * mean, 0.0)                  # guard cancellation

    # Fold normalize + affine into y = h*s + t (2 VPU passes over [B, TH]).
    s = bgb[1:2, :] * jax.lax.rsqrt(var + _BN_EPS)
    t = bgb[2:3, :] - mean * s
    h_norm = h * s + t

    # ---- fc23 partial product, accumulated into the resident out block ----
    o_ref[...] += jnp.dot(h_norm.astype(jnp.bfloat16), w2_ref[...],
                          preferred_element_type=jnp.float32)


def _pad_dim(a, axis, mult):
    pad = (-a.shape[axis]) % mult
    if pad:
        widths = [(0, 0)] * a.ndim
        widths[axis] = (0, pad)
        a = jnp.pad(a, widths)
    return a


def _vmem_estimate(B, Fp, Op, tile_h):
    # Double-buffered blocks (conservative: count x / b2 / out double too).
    x_b = 2 * B * Fp * 2                # bf16
    w1_b = 2 * Fp * tile_h * 2          # bf16
    bgb_b = 2 * 8 * tile_h * 4          # f32
    w2_b = 2 * tile_h * Op * 2          # bf16
    b2_b = 2 * 8 * Op * 4               # f32 (padded to 8 sublanes)
    out_b = 2 * B * Op * 4              # f32
    return x_b + w1_b + bgb_b + w2_b + b2_b + out_b


def _pick_tile_h(Hp, B, Fp, Op):
    # Largest tile that divides Hp and fits a budget safe on all generations
    # (v7x physical VMEM is 64 MiB; leave headroom).
    budget = 48 * _MIB
    for cand in (1024, 512, 256, 128):
        th = min(cand, Hp)
        if Hp % th:
            continue
        if _vmem_estimate(B, Fp, Op, th) <= budget:
            return th
    return 128


@jax.jit
def mlp_pro_forward(x, w1, b1, gamma, beta, w2, b2):
    B, F = x.shape
    H = w1.shape[1]
    O = w2.shape[1]

    # Lane-dense padding: zero-pad feature dims to multiples of 128.
    # Padded hidden features give h == 0 and (with gamma/beta padded by 0)
    # h_norm == 0; padded W2 rows/cols are 0, so the sliced result is exact.
    xp = _pad_dim(x, 1, _LANE).astype(jnp.bfloat16)
    w1p = _pad_dim(_pad_dim(w1, 0, _LANE), 1, _LANE).astype(jnp.bfloat16)
    w2p = _pad_dim(_pad_dim(w2, 0, _LANE), 1, _LANE).astype(jnp.bfloat16)
    b2p = _pad_dim(b2, 1, _LANE)

    Fp, Hp, Op = xp.shape[1], w1p.shape[1], w2p.shape[1]

    # Pack b1 / gamma / beta into one [8, Hp] f32 array (rows 0/1/2), so each
    # grid step issues a single small DMA instead of three.
    bgb = jnp.zeros((8, Hp), jnp.float32)
    bgb = bgb.at[0, :H].set(b1.reshape(-1))
    bgb = bgb.at[1, :H].set(gamma.reshape(-1))
    bgb = bgb.at[2, :H].set(beta.reshape(-1))

    tile_h = _pick_tile_h(Hp, B, Fp, Op)
    num_h = Hp // tile_h

    vmem_need = _vmem_estimate(B, Fp, Op, tile_h)
    vmem_limit = int(min(max(2 * vmem_need, 32 * _MIB), 56 * _MIB))

    cost = pl.CostEstimate(
        flops=2 * B * (Fp * Hp + Hp * Op),
        transcendentals=B * Hp + Hp,
        bytes_accessed=(2 * (B * Fp + Fp * Hp + Hp * Op)          # bf16 streams
                        + 4 * (B * Op + 8 * Hp + Op)),            # f32 rest
    )

    out = pl.pallas_call(
        mlp_pro_kernel,
        out_shape=jax.ShapeDtypeStruct((B, Op), jnp.float32),
        grid_spec=pltpu.PrefetchScalarGridSpec(
            num_scalar_prefetch=0,
            grid=(num_h,),
            in_specs=[
                pl.BlockSpec((B, Fp), lambda h: (0, 0)),        # x (resident, bf16)
                pl.BlockSpec((Fp, tile_h), lambda h: (0, h)),   # W1 tile (bf16)
                pl.BlockSpec((8, tile_h), lambda h: (0, h)),    # packed b1/gamma/beta
                pl.BlockSpec((tile_h, Op), lambda h: (h, 0)),   # W2 tile (bf16)
                pl.BlockSpec((1, Op), lambda h: (0, 0)),        # b2 (resident)
            ],
            out_specs=pl.BlockSpec((B, Op), lambda h: (0, 0)),
        ),
        compiler_params=pltpu.CompilerParams(
            dimension_semantics=("arbitrary",),   # H axis is a reduction
            vmem_limit_bytes=vmem_limit,
        ),
        cost_estimate=cost,
    )(xp, w1p, bgb, w2p, b2p)

    return out[:, :O]


def reference_forward(x, w1, b1, gamma, beta, w2, b2):
    # Pure f32 reference matching PyTorch BatchNorm1d training-mode forward
    # (batch mean, biased variance, eps=1e-5, affine).
    h = jnp.tanh(x @ w1 + b1)
    mean = jnp.mean(h, axis=0, keepdims=True)
    var = jnp.mean((h - mean) ** 2, axis=0, keepdims=True)
    h = (h - mean) / jnp.sqrt(var + _BN_EPS) * gamma + beta
    return h @ w2 + b2


if __name__ == "__main__":
    # Small shapes consistent with the module: x is [batch, n_feature].
    B, n_feature, n_hidden, n_output = 8, 32, 64, 16

    key = jax.random.PRNGKey(0)
    kx, kw1, kb1, kw2, kb2 = jax.random.split(key, 5)

    x = jax.random.normal(kx, (B, n_feature), dtype=jnp.float32)

    # Deterministic parameter init (PyTorch-Linear-style uniform bounds).
    bound1 = 1.0 / jnp.sqrt(n_feature)
    w1 = jax.random.uniform(kw1, (n_feature, n_hidden), jnp.float32, -bound1, bound1)
    b1 = jax.random.uniform(kb1, (1, n_hidden), jnp.float32, -bound1, bound1)

    gamma = jnp.ones((1, n_hidden), jnp.float32)   # BatchNorm1d default weight
    beta = jnp.zeros((1, n_hidden), jnp.float32)   # BatchNorm1d default bias

    bound2 = 1.0 / jnp.sqrt(n_hidden)
    w2 = jax.random.uniform(kw2, (n_hidden, n_output), jnp.float32, -bound2, bound2)
    b2 = jax.random.uniform(kb2, (1, n_output), jnp.float32, -bound2, bound2)

    out = mlp_pro_forward(x, w1, b1, gamma, beta, w2, b2)
    out = jax.block_until_ready(out)

    ref = reference_forward(x, w1, b1, gamma, beta, w2, b2)
    assert out.shape == (B, n_output)
    # Tolerance loosened vs 1e-5 because x/W1/W2 are bf16 (f32 accumulation);
    # BN statistics and all element-wise math remain f32.
    assert jnp.allclose(out, ref, atol=3e-2, rtol=2e-2), (
        float(jnp.max(jnp.abs(out - ref))))

    print("KERNEL_OK")
</pallas_src>

<mosaic_0001>
module attributes {stable_mosaic.version = 11 : i64} {
  func.func @mlp_pro_kernel(%arg0: i32, %arg1: memref<8x128xbf16, #tpu.memory_space<vmem>>, %arg2: memref<128x128xbf16, #tpu.memory_space<vmem>>, %arg3: memref<8x128xf32, #tpu.memory_space<vmem>>, %arg4: memref<128x128xbf16, #tpu.memory_space<vmem>>, %arg5: memref<1x128xf32, #tpu.memory_space<vmem>>, %arg6: memref<8x128xf32, #tpu.memory_space<vmem>>) attributes {dimension_semantics = [#tpu.dimension_semantics<arbitrary>], iteration_bounds = array<i64: 1>, scalar_prefetch = 0 : i64, scratch_operands = 0 : i64, tpu.core_type = #tpu.core_type<tc>, window_params = [{pipeline_mode = #tpu.pipeline_mode<synchronous>, transform_indices = @transform_0, window_bounds = array<i64: 8, 128>}, {transform_indices = @transform_1, window_bounds = array<i64: 128, 128>}, {transform_indices = @transform_2, window_bounds = array<i64: 8, 128>}, {transform_indices = @transform_3, window_bounds = array<i64: 128, 128>}, {pipeline_mode = #tpu.pipeline_mode<synchronous>, transform_indices = @transform_4, window_bounds = array<i64: 1, 128>}, {pipeline_mode = #tpu.pipeline_mode<synchronous>, transform_indices = @transform_5, window_bounds = array<i64: 8, 128>}]} {
    %c0_i32 = arith.constant 0 : i32
    %0 = arith.cmpi eq, %arg0, %c0_i32 : i32
    %1 = arith.extui %0 : i1 to i32
    %c0_i32_0 = arith.constant 0 : i32
    %2 = arith.cmpi ne, %1, %c0_i32_0 : i32
    scf.if %2 {
      %c0_19 = arith.constant 0 : index
      %c0_20 = arith.constant 0 : index
      %42 = vector.load %arg5[%c0_19, %c0_20] : memref<1x128xf32, #tpu.memory_space<vmem>>, vector<1x128xf32>
      %43 = vector.shape_cast %42 : vector<1x128xf32> to vector<1x128xf32>
      %44 = vector.broadcast %43 : vector<1x128xf32> to vector<8x128xf32>
      %c0_21 = arith.constant 0 : index
      %c0_22 = arith.constant 0 : index
      %45 = vector.load %arg6[%c0_21, %c0_22] : memref<8x128xf32, #tpu.memory_space<vmem>>, vector<8x128xf32>
      tpu.vector_store %arg6[%c0_21, %c0_22], %44 {strides = array<i32>} : memref<8x128xf32, #tpu.memory_space<vmem>>, vector<8x128xf32>,
    } else {
    }
    %c0 = arith.constant 0 : index
    %c0_1 = arith.constant 0 : index
    %3 = vector.load %arg3[%c0, %c0_1] : memref<8x128xf32, #tpu.memory_space<vmem>>, vector<8x128xf32>
    %c0_2 = arith.constant 0 : index
    %c0_3 = arith.constant 0 : index
    %4 = vector.load %arg1[%c0_2, %c0_3] : memref<8x128xbf16, #tpu.memory_space<vmem>>, vector<8x128xbf16>
    %c0_4 = arith.constant 0 : index
    %c0_5 = arith.constant 0 : index
    %5 = vector.load %arg2[%c0_4, %c0_5] : memref<128x128xbf16, #tpu.memory_space<vmem>>, vector<128x128xbf16>
    %cst = arith.constant dense<0.000000e+00> : vector<8x128xf32>
    %6 = tpu.matmul %4, %5, %cst {dimension_numbers = #tpu.dot_dimension_numbers<[1], [0], [0], [1], [0, 0, 1, 1], [], []>} : vector<8x128xbf16>, vector<128x128xbf16>, vector<8x128xf32> -> vector<8x128xf32>
    %7 = vector.extract_strided_slice %3 {offsets = [0, 0], sizes = [1, 128], strides = [1, 1]} : vector<8x128xf32> to vector<1x128xf32>
    %8 = vector.broadcast %7 : vector<1x128xf32> to vector<8x128xf32>
    %9 = arith.addf %6, %8 : vector<8x128xf32>
    %10 = math.tanh %9 : vector<8x128xf32>
    %cst_6 = arith.constant dense<0.000000e+00> : vector<128xf32>
    %11 = vector.multi_reduction <add>, %10, %cst_6 [0] : vector<8x128xf32> to vector<128xf32>
    %12 = vector.shape_cast %11 : vector<128xf32> to vector<1x128xf32>
    %cst_7 = arith.constant 1.250000e-01 : f32
    %13 = vector.broadcast %cst_7 : f32 to vector<1x128xf32>
    %14 = arith.mulf %12, %13 : vector<1x128xf32>
    %15 = arith.mulf %10, %10 : vector<8x128xf32>
    %cst_8 = arith.constant dense<0.000000e+00> : vector<128xf32>
    %16 = vector.multi_reduction <add>, %15, %cst_8 [0] : vector<8x128xf32> to vector<128xf32>
    %17 = vector.shape_cast %16 : vector<128xf32> to vector<1x128xf32>
    %cst_9 = arith.constant 1.250000e-01 : f32
    %18 = vector.broadcast %cst_9 : f32 to vector<1x128xf32>
    %19 = arith.mulf %17, %18 : vector<1x128xf32>
    %20 = arith.mulf %14, %14 : vector<1x128xf32>
    %21 = arith.subf %19, %20 : vector<1x128xf32>
    %cst_10 = arith.constant 0.000000e+00 : f32
    %22 = vector.broadcast %cst_10 : f32 to vector<1x128xf32>
    %23 = arith.maximumf %21, %22 : vector<1x128xf32>
    %24 = vector.extract_strided_slice %3 {offsets = [1, 0], sizes = [1, 128], strides = [1, 1]} : vector<8x128xf32> to vector<1x128xf32>
    %cst_11 = arith.constant 9.99999974E-6 : f32
    %25 = vector.broadcast %cst_11 : f32 to vector<1x128xf32>
    %26 = arith.addf %23, %25 : vector<1x128xf32>
    %27 = math.rsqrt %26 : vector<1x128xf32>
    %28 = arith.mulf %24, %27 : vector<1x128xf32>
    %29 = vector.extract_strided_slice %3 {offsets = [2, 0], sizes = [1, 128], strides = [1, 1]} : vector<8x128xf32> to vector<1x128xf32>
    %30 = arith.mulf %14, %28 : vector<1x128xf32>
    %31 = arith.subf %29, %30 : vector<1x128xf32>
    %32 = vector.broadcast %28 : vector<1x128xf32> to vector<8x128xf32>
    %33 = arith.mulf %10, %32 : vector<8x128xf32>
    %34 = vector.broadcast %31 : vector<1x128xf32> to vector<8x128xf32>
    %35 = arith.addf %33, %34 : vector<8x128xf32>
    %c0_12 = arith.constant 0 : index
    %c0_13 = arith.constant 0 : index
    %36 = vector.load %arg6[%c0_12, %c0_13] : memref<8x128xf32, #tpu.memory_space<vmem>>, vector<8x128xf32>
    %37 = arith.truncf %35 : vector<8x128xf32> to vector<8x128xbf16>
    %c0_14 = arith.constant 0 : index
    %c0_15 = arith.constant 0 : index
    %38 = vector.load %arg4[%c0_14, %c0_15] : memref<128x128xbf16, #tpu.memory_space<vmem>>, vector<128x128xbf16>
    %cst_16 = arith.constant dense<0.000000e+00> : vector<8x128xf32>
    %39 = tpu.matmul %37, %38, %cst_16 {dimension_numbers = #tpu.dot_dimension_numbers<[1], [0], [0], [1], [0, 0, 1, 1], [], []>} : vector<8x128xbf16>, vector<128x128xbf16>, vector<8x128xf32> -> vector<8x128xf32>
    %40 = arith.addf %36, %39 : vector<8x128xf32>
    %c0_17 = arith.constant 0 : index
    %c0_18 = arith.constant 0 : index
    %41 = vector.load %arg6[%c0_17, %c0_18] : memref<8x128xf32, #tpu.memory_space<vmem>>, vector<8x128xf32>
    tpu.vector_store %arg6[%c0_17, %c0_18], %40 {strides = array<i32>} : memref<8x128xf32, #tpu.memory_space<vmem>>, vector<8x128xf32>,
    return
  }
  func.func @transform_0(%arg0: i32) -> (i32, i32) {
    %c0_i32 = arith.constant 0 : i32
    %c0_i32_0 = arith.constant 0 : i32
    %c0_i32_1 = arith.constant 0 : i32
    return %c0_i32, %c0_i32_0 : i32, i32
  }
  func.func @transform_1(%arg0: i32) -> (i32, i32) {
    %c0_i32 = arith.constant 0 : i32
    %c0_i32_0 = arith.constant 0 : i32
    return %c0_i32, %arg0 : i32, i32
  }
  func.func @transform_2(%arg0: i32) -> (i32, i32) {
    %c0_i32 = arith.constant 0 : i32
    %c0_i32_0 = arith.constant 0 : i32
    return %c0_i32, %arg0 : i32, i32
  }
  func.func @transform_3(%arg0: i32) -> (i32, i32) {
    %c0_i32 = arith.constant 0 : i32
    %c0_i32_0 = arith.constant 0 : i32
    return %arg0, %c0_i32 : i32, i32
  }
  func.func @transform_4(%arg0: i32) -> (i32, i32) {
    %c0_i32 = arith.constant 0 : i32
    %c0_i32_0 = arith.constant 0 : i32
    %c0_i32_1 = arith.constant 0 : i32
    return %c0_i32, %c0_i32_0 : i32, i32
  }
  func.func @transform_5(%arg0: i32) -> (i32, i32) {
    %c0_i32 = arith.constant 0 : i32
    %c0_i32_0 = arith.constant 0 : i32
    %c0_i32_1 = arith.constant 0 : i32
    return %c0_i32, %c0_i32_0 : i32, i32
  }
}

</mosaic_0001>

<bundles_post_ra>
// kernel: mlp_pro_forward.1
= control target key start
LH: loop header
LB: loop body
LE: loop exit
PB: predicated region body
PF: predicated region fallthrough
CT: control target
= control target key end

     0   :  { %v425_v1 = vmov 0.0   ;;  %vm426_vm0 = vmmov 0   ;;  %s527_s0 = inlined_call_operand.vmem [shape: bf16[8,128], index: 0, kind: input, shape index: {}]   ;;  %s528_s1 = inlined_call_operand.vmem [shape: bf16[128,128], index: 1, kind: input, shape index: {}]   ;;  %s529_s2 = inlined_call_operand.vmem [shape: f32[8,128], index: 2, kind: input, shape index: {}]   ;;  %s530_s3 = inlined_call_operand.vmem [shape: bf16[128,128], index: 3, kind: input, shape index: {}]   ;;  %s531_s4 = inlined_call_operand.vmem [shape: f32[1,128], index: 4, kind: input, shape index: {}]   ;;  %s532_s5 = inlined_call_operand.hbm [shape: f32[8,128], index: 5, kind: output, shape index: {}]  }
   0x1   :  { %v381_v0 = vld [vmem:[%s528_s1] sm:$0xff]   ;;  %338 = vmatprep.subr.bf16.mxu0 %v425_v1  ;;  %358 = vmatprep.subr.bf16.mxu1 %v425_v1  ;;  %v382_v2 = vld [vmem:[%s528_s1 + $0x8] sm:$0xff]   ;;  %v383_v3 = vld [vmem:[%s528_s1 + $0x10] sm:$0xff]  }
   0x2   :  { %339 = vmatpush3.bf16.msra.mxu0 %v381_v0  ;;  %354 = vmatprep.mubr.msk.bf16.mxu0 %vm426_vm0, %v425_v1  ;;  %v384_v4 = vld [vmem:[%s528_s1 + $0x18] sm:$0xff]   ;;  %v385_v5 = vld [vmem:[%s528_s1 + $0x20] sm:$0xff]  }
   0x3   :  { %340 = vmatprep.subr.bf16.mxu0 %v425_v1  ;;  %374 = vmatprep.mubr.msk.bf16.mxu1 %vm426_vm0, %v425_v1 }
   0x6   :  { %341 = vmatpush3.bf16.msra.mxu0 %v382_v2 }
   0x7   :  { %342 = vmatprep.subr.bf16.mxu0 %v425_v1 }
   0xa   :  { %343 = vmatpush3.bf16.msra.mxu0 %v383_v3 }
   0xb   :  { %344 = vmatprep.subr.bf16.mxu0 %v425_v1 }
   0xe   :  { %345 = vmatpush3.bf16.msra.mxu0 %v384_v4 }
   0xf   :  { %10 = vsyncpa [#allocation3], 0  ;;  %346 = vmatprep.subr.bf16.mxu0 %v425_v1  ;;  %v386_v6 = vld [vmem:[%s528_s1 + $0x28] sm:$0xff]   ;;  %v387_v7 = vld [vmem:[%s528_s1 + $0x30] sm:$0xff]   ;;  %v52_v18 = vlaneseq  ;;  %s427_s27 = smov [#allocation2]  }
  0x10   :  { %v388_v8 = vld [vmem:[%s528_s1 + $0x38] sm:$0xff]   ;;  %v35_v9 = vld [vmem:[%s527_s0] sm:$0xf]  ;;  %v390_v11 = vld [vmem:[%s530_s3 + $0x8] sm:$0xff]   ;;  %s295_s28 = sshll.u32 %s427_s27, 4  ;;  %s296_s28 = int_to_ptr.vmem [resolvable:$true] %s295_s28 }
  0x11   :  { %v389_v10 = vld [vmem:[%s530_s3] sm:$0xff]   ;;  %v391_v12 = vld [vmem:[%s530_s3 + $0x10] sm:$0xff]   ;;  %v392_v13 = vld [vmem:[%s530_s3 + $0x18] sm:$0xff]   ;;  %v53_v19 = vshrl.u32 %v52_v18, 7  ;;  %s401_s29 = scalar_lea.vmem %s296_s28, 128  ;;  %p406_p1 = scmp.lt.s32.totalorder %s296_s28, %s296_s28 }
  0x12   :  { %347 = vmatpush3.bf16.msra.mxu0 %v385_v5  ;;  %359 = vmatpush3.bf16.msra.mxu1 %v389_v10  ;;  %v393_v14 = vld [vmem:[%s530_s3 + $0x20] sm:$0xff]   ;;  %v394_v15 = vld [vmem:[%s530_s3 + $0x28] sm:$0xff]   ;;  %v395_v16 = vld [vmem:[%s530_s3 + $0x30] sm:$0xff]   ;;  %p402_p0 = scmp.ne.s32.totalorder %s296_s28, %s401_s29  ;;  %p407_p2 = scmp.lt.s32.totalorder %s401_s29, %s401_s29 }
  0x13   :  { %348 = vmatprep.subr.bf16.mxu0 %v425_v1  ;;  %360 = vmatprep.subr.bf16.mxu1 %v425_v1  ;;  %v396_v17 = vld [vmem:[%s530_s3 + $0x38] sm:$0xff]   ;;  %v54_v20 = vsub.s32 0, %v53_v19  ;;  %v34_v21 = vld [vmem:[%s529_s2] sm:$0xff]  ;;  %v173_v50 = vsub.s32 1, %v53_v19  ;;  %v178_v54 = vsub.s32 2, %v53_v19 }
  0x14   :  { %v303_v60 = vld [vmem:[%s531_s4] ss:$0 sm:$0xff]  ;;  %p408_p3 = por %p407_p2, %p406_p1 }
  0x15   :  { %v55_v22 = vrot.slane %v34_v21, %v54_v20 }
  0x16   :  { %349 = vmatpush3.bf16.msra.mxu0 %v386_v6  ;;  %361 = vmatpush3.bf16.msra.mxu1 %v390_v11  ;;  %p409_p4 = pnand %p408_p3, %p402_p0 }
  0x17   :  { %350 = vmatprep.subr.bf16.mxu0 %v425_v1  ;;  %362 = vmatprep.subr.bf16.mxu1 %v425_v1 }
  0x1a   :  { %351 = vmatpush3.bf16.msra.mxu0 %v387_v7  ;;  %363 = vmatpush3.bf16.msra.mxu1 %v391_v12 }
  0x1b   :  { %352 = vmatprep.subr.bf16.mxu0 %v425_v1  ;;  %364 = vmatprep.subr.bf16.mxu1 %v425_v1 }
  0x1e   :  { %353 = vmatpush3.bf16.msra.mxu0 %v388_v8  ;;  %365 = vmatpush3.bf16.msra.mxu1 %v392_v13 }
  0x1f   :  { %366 = vmatprep.subr.bf16.mxu1 %v425_v1 }
  0x21   :  { %355 = vmatmul.mubr.bf16.vlgmr.msra.gmra.mrb[0].mxu0 %v35_v9 }
  0x22   :  { %367 = vmatpush3.bf16.msra.mxu1 %v393_v14 }
  0x23   :  { %368 = vmatprep.subr.bf16.mxu1 %v425_v1 }
  0x26   :  { %369 = vmatpush3.bf16.msra.mxu1 %v394_v15 }
  0x27   :  { %370 = vmatprep.subr.bf16.mxu1 %v425_v1 }
  0x2a   :  { %371 = vmatpush3.bf16.msra.mxu1 %v395_v16 }
  0x2b   :  { %372 = vmatprep.subr.bf16.mxu1 %v425_v1 }
  0x2e   :  { %373 = vmatpush3.bf16.msra.mxu1 %v396_v17 }
  0xf4   :  { %v138_v23 = vpop.f32.mrb[0].mxu0 }
  0xf5   :  { %v139_v24 = vadd.f32 %v138_v23, %v55_v22  ;;  %v356_v25 = vpop.f32.mrb[1].mxu0 }
  0xf6   :  { %v141_v26 = vpop.f32.mrb[2].mxu0 }
  0xf7   :  { %397 = vtanh.f32 %v139_v24  ;;  %v357_v27 = vpop.f32.mrb[3].mxu0 }
 0x101   :  { %v398_v28 = vpop.eup %397 }
 0x102   :  { %v145_v29 = vrot.slane %v398_v28, 4  ;;  %v152_v30 = vmul.f32 %v398_v28, %v398_v28 }
 0x104   :  { %v146_v31 = vadd.f32 %v398_v28, %v145_v29  ;;  %v153_v32 = vrot.slane %v152_v30, 4 }
 0x106   :  { %v147_v33 = vrot.slane %v146_v31, 2  ;;  %v154_v34 = vadd.f32 %v153_v32, %v152_v30 }
 0x108   :  { %v148_v35 = vadd.f32 %v147_v33, %v146_v31  ;;  %v155_v36 = vrot.slane %v154_v34, 2 }
 0x10a   :  { %v149_v37 = vrot.slane %v148_v35, 1  ;;  %v156_v38 = vadd.f32 %v155_v36, %v154_v34 }
 0x10c   :  { %v150_v39 = vadd.f32 %v149_v37, %v148_v35  ;;  %v157_v40 = vrot.slane %v156_v38, 1 }
 0x10e   :  { %v151_v41 = vmul.f32 0.125, %v150_v39  ;;  %v158_v42 = vadd.f32 %v157_v40, %v156_v38 }
 0x110   :  { %v159_v43 = vmul.f32 0.125, %v158_v42  ;;  %v160_v44 = vmul.f32 %v151_v41, %v151_v41 }
 0x112   :  { %v161_v45 = vsub.f32 %v159_v43, %v160_v44 }
 0x114   :  { %v162_v46 = vmax.f32 %v161_v45, 0.0 }
 0x116   :  { %v163_v47 = vadd.f32 1e-05, %v162_v46 }
 0x118   :  { %399 = vrsqrt.f32 %v163_v47 }
 0x122   :  { %v400_v48 = vpop.eup %399 }
 0x123   :  { %v165_v49 = vmul.f32 %v400_v48, %v34_v21 }
 0x125   :  { %v166_v51 = vmul.f32 %v165_v49, %v151_v41  ;;  %v174_v53 = vrot.slane %v165_v49, %v173_v50 }
 0x127   :  { %v168_v52 = vrot.slane %v166_v51, 7  ;;  %v175_v56 = vmul.f32 %v398_v28, %v174_v53 }
 0x129   :  { %v170_v55 = vsub.f32 %v34_v21, %v168_v52 }
 0x12b   :  { %v179_v57 = vrot.slane %v170_v55, %v178_v54 }
 0x12d   :  { %v180_v58 = vadd.f32 %v179_v57, %v175_v56 }
 0x12f   :  { %v182_v59 = vpack.c.bf16 %v180_v58, %v180_v58 }
 0x131   :  { %375 = vmatmul.mubr.bf16.vlgmr.msra.gmra.mrb[0].mxu1 %v182_v59 }
 0x204   :  { %v281_v61 = vpop.f32.mrb[0].mxu1 }
 0x205   :  { %v287_v62 = vadd.f32 %v303_v60, %v281_v61  ;;  %v376_v63 = vpop.f32.mrb[1].mxu1 }
 0x206   :  { %v284_v0 = vpop.f32.mrb[2].mxu1 }
 0x207   :  { %288 = vst [vmem:[#allocation2] sm:$0xff] %v287_v62  ;;  %v377_v1 = vpop.f32.mrb[3].mxu1 }
 0x208   :  { %412 = shalt.err (!%p409_p4)
}
 0x209   :  { %s413_s4 = scalar_lea.hbm %s532_s5, 128 }
 0x20a   :  { %p414_p5 = scmp.ne.s32.totalorder %s532_s5, %s413_s4  ;;  %p417_p6 = scmp.lt.u32.totalorder %s413_s4, %s532_s5 }
 0x20c   :  { %p419_p7 = pnand %p417_p6, %p414_p5 }
 0x20e   :  { %422 = shalt.err (!%p419_p7)
}
 0x20f   :  { %298 = dma.vmem_to_hbm [thread:$0]  %s296_s28, 128, %s532_s5, [#allocation3]  }
 0x210   :  { %423 = dma.done.wait [#allocation3], 128  }
 0x211   :  { %424 = vsyncadd [#allocation3], 4294967168 }
 0x212   :  { %302 = vsyncpa [#allocation3], 1 }

</bundles_post_ra>
